<compile_context>
chip_gen: v7x
topology: tpu7x:2x2x1
jax: 0.10.0
libtpu: 0.0.40
codegen_flags: <defaults>
</compile_context>

<pallas_src>
import functools

import numpy as np
import jax
import jax.numpy as jnp
from jax.experimental import pallas as pl
from jax.experimental.pallas import tpu as pltpu


# ---------------------------------------------------------------------------
# Config (mirrors cfg.* fields used by MultiPoseLoss.forward)
# ---------------------------------------------------------------------------
class _Loss:
    MSE_LOSS = False
    DENSE_HP = False
    REG_LOSS = "l1"
    HM_HP = True
    REG_OFFSET = True
    REG_HP_OFFSET = True
    HM_WEIGHT = 1.0
    WH_WEIGHT = 0.1
    OFF_WEIGHT = 1.0
    HP_WEIGHT = 1.0
    HM_HP_WEIGHT = 1.0


class _Model:
    NUM_STACKS = 1
    OUTPUT_RES = 16


class Cfg:
    LOSS = _Loss
    MODEL = _Model


# ---------------------------------------------------------------------------
# Helpers
# ---------------------------------------------------------------------------
def _round_up(x, m):
    return ((x + m - 1) // m) * m


def _ceil_div(a, b):
    return -(-a // b)


def _choose_focal_tile(hw, rows_total, max_block_bytes=2 << 20):
    """Lane tile for the fused focal kernel.

    Largest 128-multiple that divides hw, keeps the summed per-step input
    bytes (rows_total * tile * 4) under max_block_bytes (so all heatmap
    inputs x 2 double-buffers stay well under v5e's 16 MiB scoped-VMEM
    default) AND keeps the grid at >= 4 steps for realistic hw (DMA/compute
    overlap + megacore sharding on v7x).  For small hw it still forces >= 2
    grid steps."""
    if hw % 128 != 0:
        # TODO(synk): non-128-multiple spatial sizes fall back to one block
        # (does not occur for standard CenterNet output resolutions).
        return hw
    max_elems = max_block_bytes // 4
    cap = max(512, hw // 4)            # >= 4 grid steps when hw >= 2048
    tile = 128
    t = 256
    while t <= hw:
        if hw % t == 0 and rows_total * t <= max_elems and t <= cap:
            tile = t
        t *= 2
    if tile == hw and hw >= 256 and (hw // 2) % 128 == 0:
        tile = hw // 2                 # guarantee >= 2 grid steps
    return tile


# ---------------------------------------------------------------------------
# Pallas kernels
# ---------------------------------------------------------------------------
def _focal_multi_kernel(*refs, num_maps):
    """CenterNet focal-loss partial sums for `num_maps` heatmaps at once.

    refs = (x0, gt0, x1, gt1, ..., out).  Each (x, gt) pair is a
    (rows_i, TILE) block of one heatmap.  Per heatmap n, writes into
    out (1, 8, 128) lanes:
      [0,0,3n+0] = sum(log(p) * (1-p)^2 * [gt==1])
      [0,0,3n+1] = sum(log(1-p) * p^2 * (1-gt)^4 * [gt<1])
      [0,0,3n+2] = num positives
    with p = clamp(sigmoid(logits), 1e-4, 1-1e-4)  (== _sigmoid in PyTorch).
    Only ONE log per element (pos/neg are disjoint -> select the argument).
    """
    in_refs = refs[:-1]
    out_ref = refs[-1]

    lane = jax.lax.broadcasted_iota(jnp.int32, (1, 8, 128), 2)
    vec = jnp.zeros((1, 8, 128), jnp.float32)

    for n in range(num_maps):
        x = in_refs[2 * n][...].astype(jnp.float32)
        g = in_refs[2 * n + 1][...].astype(jnp.float32)

        pred = jnp.clip(jax.nn.sigmoid(x), 1e-4, 1.0 - 1e-4)
        is_pos = g == 1.0
        pos = is_pos.astype(jnp.float32)
        neg = 1.0 - pos                       # gt in [0,1] => (gt<1) == 1-pos
        omp = 1.0 - pred
        omg = 1.0 - g
        w2 = omg * omg
        neg_w = w2 * w2                       # (1-gt)^4 with VPU muls

        lg = jnp.log(jnp.where(is_pos, pred, omp))   # one EUP log per element
        pos_loss = lg * (omp * omp) * pos
        neg_loss = lg * (pred * pred) * neg_w * neg

        ps = jnp.sum(pos_loss)
        ns = jnp.sum(neg_loss)
        npos = jnp.sum(pos)

        vec = jnp.where(lane == 3 * n, ps, vec)
        vec = jnp.where(lane == 3 * n + 1, ns, vec)
        vec = jnp.where(lane == 3 * n + 2, npos, vec)

    out_ref[...] = vec


def _reg_groups_kernel(pred_ref, mask_ref, tgt_ref, out_ref, *, group_slices):
    """Masked-L1 partial sums over a lane-dense (C, BLOCK_L) block.

    For channel-row group g = (lo, hi):
      out[0, 0, 2g]   = sum |pred*m - t*m| over rows [lo, hi)
      out[0, 0, 2g+1] = sum(m)            over rows [lo, hi)
    One lane-reduce per tensor; group combination happens on the tiny (C, 1)
    row sums.  Fully vectorized — no per-row loop, no sub-lane slicing.
    """
    p = pred_ref[...].astype(jnp.float32)
    m = mask_ref[...].astype(jnp.float32)
    t = tgt_ref[...].astype(jnp.float32)

    diff = jnp.abs(p * m - t * m)
    row_l1 = jnp.sum(diff, axis=1, keepdims=True)     # (C, 1)
    row_m = jnp.sum(m, axis=1, keepdims=True)         # (C, 1)
    ridx = jax.lax.broadcasted_iota(jnp.int32, row_l1.shape, 0)

    lane = jax.lax.broadcasted_iota(jnp.int32, (1, 8, 128), 2)
    vec = jnp.zeros((1, 8, 128), jnp.float32)
    for gi, (lo, hi) in enumerate(group_slices):
        sel = jnp.logical_and(ridx >= lo, ridx < hi)
        l1 = jnp.sum(jnp.where(sel, row_l1, 0.0))
        ms = jnp.sum(jnp.where(sel, row_m, 0.0))
        vec = jnp.where(lane == 2 * gi, l1, vec)
        vec = jnp.where(lane == 2 * gi + 1, ms, vec)
    out_ref[...] = vec


# ---------------------------------------------------------------------------
# Wrappers
# ---------------------------------------------------------------------------
def focal_losses_pallas(pairs):
    """FocalLoss (with fused _sigmoid) for N heatmaps sharing H*W, in ONE
    pallas_call.  `pairs` is a list of (logits_nchw, gt_nchw).  Returns a list
    of scalar losses (one per heatmap, separate num_pos normalization)."""
    hw = None
    flat, row_counts = [], []
    for logits, gt in pairs:
        B, C, H, W = logits.shape
        if hw is None:
            hw = H * W
        assert H * W == hw, "fused focal heatmaps must share H*W"
        rows = B * C
        flat.append(logits.reshape(rows, hw))   # free reshape, native dtype
        flat.append(gt.reshape(rows, hw))
        row_counts.append(rows)

    rows_total = sum(row_counts)
    tile = _choose_focal_tile(hw, rows_total)
    grid_n = hw // tile

    in_specs = []
    for rows in row_counts:
        spec = pl.BlockSpec((rows, tile), lambda i: (0, i))
        in_specs += [spec, spec]

    kern = functools.partial(_focal_multi_kernel, num_maps=len(pairs))
    parts = pl.pallas_call(
        kern,
        out_shape=jax.ShapeDtypeStruct((grid_n, 8, 128), jnp.float32),
        grid=(grid_n,),
        in_specs=in_specs,
        out_specs=pl.BlockSpec((1, 8, 128), lambda i: (i, 0, 0)),
        compiler_params=pltpu.CompilerParams(
            dimension_semantics=("parallel",)),
    )(*flat)

    losses = []
    for n in range(len(pairs)):
        pos_sum = jnp.sum(parts[:, 0, 3 * n])
        neg_sum = jnp.sum(parts[:, 0, 3 * n + 1])
        num_pos = jnp.sum(parts[:, 0, 3 * n + 2])
        losses.append(jnp.where(
            num_pos == 0,
            -neg_sum,
            -(pos_sum + neg_sum) / jnp.maximum(num_pos, 1.0)))
    return losses


def _gather_feat_cm(feat_nchw, ind_bk):
    """_tranpose_and_gather_feat, lane-dense: (B,C,H,W), ind (B,K) -> (C, B*K).

    Gathers only the K addressed spatial positions (no full-map transpose)."""
    B, C, H, W = feat_nchw.shape
    feat_r = feat_nchw.reshape(B, C, H * W)               # free reshape
    idx = ind_bk.astype(jnp.int32)[:, None, :]            # (B,1,K)
    g = jnp.take_along_axis(feat_r, idx, axis=2)          # (B,C,K)
    return jnp.transpose(g, (1, 0, 2)).reshape(C, -1)     # (C, B*K)


def _to_cm(x_bkc):
    """(B, K, C) ground-truth / mask -> lane-dense (C, B*K), float32."""
    c = x_bkc.shape[-1]
    return jnp.transpose(x_bkc.astype(jnp.float32), (2, 0, 1)).reshape(c, -1)


def _bcast_mask_cm(mask_bk, c):
    """(B, K) row mask -> lane-dense (c, B*K), float32 (broadcast, not copied
    per original channel count in the wrapper)."""
    m = mask_bk.astype(jnp.float32).reshape(1, -1)
    return jnp.broadcast_to(m, (c, m.shape[1]))


def _stack_column_block(groups, pad_before, pad_after):
    """Stack one column block's channel groups (each (C_i, Mb)) along rows,
    zero-filling rows owned by groups from the other column block.  Zero mask
    rows contribute exactly 0 to both the L1 sum and the mask sum."""
    mb = groups[0][1].shape[1]

    def slab(which):
        parts = []
        if pad_before:
            parts.append(jnp.zeros((pad_before, mb), jnp.float32))
        for grp in groups:
            parts.append(grp[which + 1].astype(jnp.float32))
        if pad_after:
            parts.append(jnp.zeros((pad_after, mb), jnp.float32))
        return parts[0] if len(parts) == 1 else jnp.concatenate(parts, axis=0)

    return slab(0), slab(1), slab(2)


def masked_l1_group_losses(pred_cm, mask_cm, tgt_cm, group_slices):
    """ONE pallas_call computing, per channel-row group (lo, hi):
         sum |pred*m - t*m| / (sum(m) + 1e-4)
    over a lane-dense (C, M) slab (M on the 128-lane axis)."""
    C, M = pred_cm.shape
    m128 = _round_up(M, 128)
    if m128 >= 256:
        n_blocks = max(2, _ceil_div(m128, 2048))   # >= 2 steps (v7x megacore)
        block_l = _round_up(_ceil_div(m128, n_blocks), 128)
        m_pad = block_l * n_blocks
    else:
        n_blocks, block_l, m_pad = 1, m128, m128
    if m_pad != M:
        pad = ((0, 0), (0, m_pad - M))
        pred_cm = jnp.pad(pred_cm, pad)
        mask_cm = jnp.pad(mask_cm, pad)   # zero mask => padded cols contribute 0
        tgt_cm = jnp.pad(tgt_cm, pad)

    G = len(group_slices)
    assert 2 * G <= 128

    kern = functools.partial(_reg_groups_kernel,
                             group_slices=tuple(group_slices))
    parts = pl.pallas_call(
        kern,
        out_shape=jax.ShapeDtypeStruct((n_blocks, 8, 128), jnp.float32),
        grid=(n_blocks,),
        in_specs=[pl.BlockSpec((C, block_l), lambda i: (0, i))] * 3,
        out_specs=pl.BlockSpec((1, 8, 128), lambda i: (i, 0, 0)),
        compiler_params=pltpu.CompilerParams(
            dimension_semantics=("parallel",)),
    )(pred_cm, mask_cm, tgt_cm)

    losses = []
    for gi in range(G):
        l1 = jnp.sum(parts[:, 0, 2 * gi])
        ms = jnp.sum(parts[:, 0, 2 * gi + 1])
        losses.append(l1 / (ms + 1e-4))
    return losses


def multi_pose_loss(outputs, batch, cfg=Cfg):
    """JAX/Pallas port of MultiPoseLoss.forward (default cfg branches)."""
    hm, wh, hps, reg, hm_hp, hp_offset = outputs
    ns = cfg.MODEL.NUM_STACKS
    L = cfg.LOSS

    hm_loss = jnp.float32(0.0)
    wh_loss = jnp.float32(0.0)
    off_loss = jnp.float32(0.0)
    hp_loss = jnp.float32(0.0)
    hm_hp_loss = jnp.float32(0.0)
    hp_offset_loss = jnp.float32(0.0)

    for _ in range(ns):
        # ---- focal losses: hm (+ hm_hp) fused into ONE pallas_call --------
        # _sigmoid() is fused into the kernel.
        pairs = [(hm, batch["hm"])]
        use_hm_hp = L.HM_HP and L.HM_HP_WEIGHT > 0 and not L.MSE_LOSS
        if use_hm_hp:
            pairs.append((hm_hp, batch["hm_hp"]))
        # TODO(synk): MSE_LOSS / DENSE_HP branches not implemented.
        focal = focal_losses_pallas(pairs)
        hm_loss = hm_loss + focal[0] / ns
        if use_hm_hp:
            hm_hp_loss = hm_hp_loss + focal[1] / ns

        # ---- regression losses: hps / wh / reg / hp_offset in ONE call ----
        # objects column block: groups sharing batch['ind'] (M1 = B*K cols)
        obj_groups = [("hp",
                       _gather_feat_cm(hps, batch["ind"]),
                       _to_cm(batch["hps_mask"]),
                       _to_cm(batch["hps"]))]
        if L.WH_WEIGHT > 0:
            obj_groups.append(("wh",
                               _gather_feat_cm(wh, batch["ind"]),
                               _bcast_mask_cm(batch["reg_mask"],
                                              batch["wh"].shape[-1]),
                               _to_cm(batch["wh"])))
        if L.REG_OFFSET and L.OFF_WEIGHT > 0:
            obj_groups.append(("off",
                               _gather_feat_cm(reg, batch["ind"]),
                               _bcast_mask_cm(batch["reg_mask"],
                                              batch["reg"].shape[-1]),
                               _to_cm(batch["reg"])))
        # keypoints column block: group using batch['hp_ind'] (M2 cols)
        kp_groups = []
        if L.REG_HP_OFFSET and L.OFF_WEIGHT > 0:
            kp_groups.append(("hpo",
                              _gather_feat_cm(hp_offset, batch["hp_ind"]),
                              _bcast_mask_cm(batch["hp_mask"],
                                             batch["hp_offset"].shape[-1]),
                              _to_cm(batch["hp_offset"])))

        names, slices, row_off = [], {}, 0
        for name, p, _, _ in obj_groups + kp_groups:
            names.append(name)
            slices[name] = (row_off, row_off + p.shape[0])
            row_off += p.shape[0]
        c_tot = row_off
        obj_rows = sum(p.shape[0] for _, p, _, _ in obj_groups)
        kp_rows = c_tot - obj_rows

        col_blocks = [_stack_column_block(obj_groups, 0, kp_rows)]
        if kp_groups:
            col_blocks.append(_stack_column_block(kp_groups, obj_rows, 0))
        pred_big = jnp.concatenate([cb[0] for cb in col_blocks], axis=1)
        mask_big = jnp.concatenate([cb[1] for cb in col_blocks], axis=1)
        tgt_big = jnp.concatenate([cb[2] for cb in col_blocks], axis=1)

        glosses = masked_l1_group_losses(
            pred_big, mask_big, tgt_big, [slices[n] for n in names])
        by_name = dict(zip(names, glosses))

        hp_loss = hp_loss + by_name["hp"] / ns
        if "wh" in by_name:
            wh_loss = wh_loss + by_name["wh"] / ns
        if "off" in by_name:
            off_loss = off_loss + by_name["off"] / ns
        if "hpo" in by_name:
            hp_offset_loss = hp_offset_loss + by_name["hpo"] / ns

    loss = (
        L.HM_WEIGHT * hm_loss
        + L.WH_WEIGHT * wh_loss
        + L.OFF_WEIGHT * off_loss
        + L.HP_WEIGHT * hp_loss
        + L.HM_HP_WEIGHT * hm_hp_loss
        + L.OFF_WEIGHT * hp_offset_loss
    )
    loss_stats = {
        "loss": loss,
        "hm_loss": hm_loss,
        "hp_loss": hp_loss,
        "hm_hp_loss": hm_hp_loss,
        "hp_offset_loss": hp_offset_loss,
        "wh_loss": wh_loss,
        "off_loss": off_loss,
    }
    return loss, loss_stats


# ---------------------------------------------------------------------------
# Pure-JAX reference (for a sanity check only)
# ---------------------------------------------------------------------------
def _ref_focal(logits, gt):
    pred = jnp.clip(jax.nn.sigmoid(logits), 1e-4, 1.0 - 1e-4)
    pos = (gt == 1.0).astype(jnp.float32)
    neg = (gt < 1.0).astype(jnp.float32)
    neg_w = (1.0 - gt) ** 4
    pos_loss = jnp.sum(jnp.log(pred) * (1.0 - pred) ** 2 * pos)
    neg_loss = jnp.sum(jnp.log(1.0 - pred) * pred ** 2 * neg_w * neg)
    num_pos = jnp.sum(pos)
    return jnp.where(
        num_pos == 0, -neg_loss, -(pos_loss + neg_loss) / jnp.maximum(num_pos, 1.0)
    )


def _ref_reg_l1(feat_nchw, mask_bkc, ind_bk, target_bkc):
    B, C, H, W = feat_nchw.shape
    feat = jnp.transpose(feat_nchw, (0, 2, 3, 1)).reshape(B, H * W, C)
    pred = jnp.take_along_axis(
        feat, ind_bk.astype(jnp.int32)[:, :, None].repeat(C, axis=2), axis=1
    )
    m = mask_bkc.astype(jnp.float32)
    l1 = jnp.sum(jnp.abs(pred * m - target_bkc * m))
    return l1 / (jnp.sum(m) + 1e-4)


def _ref_multi_pose_loss(outputs, batch, cfg=Cfg):
    hm, wh, hps, reg, hm_hp, hp_offset = outputs
    ns = cfg.MODEL.NUM_STACKS
    L = cfg.LOSS
    hm_loss = _ref_focal(hm, batch["hm"]) / ns
    hm_hp_loss = _ref_focal(hm_hp, batch["hm_hp"]) / ns
    hp_loss = _ref_reg_l1(hps, batch["hps_mask"], batch["ind"], batch["hps"]) / ns
    wh_loss = _ref_reg_l1(
        wh, jnp.broadcast_to(batch["reg_mask"][:, :, None], batch["wh"].shape),
        batch["ind"], batch["wh"]) / ns
    off_loss = _ref_reg_l1(
        reg, jnp.broadcast_to(batch["reg_mask"][:, :, None], batch["reg"].shape),
        batch["ind"], batch["reg"]) / ns
    hp_offset_loss = _ref_reg_l1(
        hp_offset,
        jnp.broadcast_to(batch["hp_mask"][:, :, None], batch["hp_offset"].shape),
        batch["hp_ind"], batch["hp_offset"]) / ns
    loss = (
        L.HM_WEIGHT * hm_loss + L.WH_WEIGHT * wh_loss + L.OFF_WEIGHT * off_loss
        + L.HP_WEIGHT * hp_loss + L.HM_HP_WEIGHT * hm_hp_loss
        + L.OFF_WEIGHT * hp_offset_loss
    )
    return loss


# ---------------------------------------------------------------------------
# Main
# ---------------------------------------------------------------------------
if __name__ == "__main__":
    key = jax.random.PRNGKey(0)
    B, H, W = 2, 16, 16
    num_classes = 2          # hm channels
    num_joints = 4           # -> hps channels = 8, hm_hp channels = 4
    K = 8                    # max objects
    HW = H * W

    keys = jax.random.split(key, 20)

    # network outputs (raw logits / regressions)
    hm = jax.random.normal(keys[0], (B, num_classes, H, W), jnp.float32)
    wh = jax.random.normal(keys[1], (B, 2, H, W), jnp.float32)
    hps = jax.random.normal(keys[2], (B, num_joints * 2, H, W), jnp.float32)
    reg = jax.random.normal(keys[3], (B, 2, H, W), jnp.float32)
    hm_hp = jax.random.normal(keys[4], (B, num_joints, H, W), jnp.float32)
    hp_offset = jax.random.normal(keys[5], (B, 2, H, W), jnp.float32)
    outputs = (hm, wh, hps, reg, hm_hp, hp_offset)

    # ground-truth batch
    base_hm = jax.random.uniform(keys[6], (B, num_classes, H, W)) * 0.9
    peaks_hm = jax.random.uniform(keys[7], (B, num_classes, H, W)) > 0.97
    gt_hm = jnp.where(peaks_hm, 1.0, base_hm).astype(jnp.float32)

    base_hmhp = jax.random.uniform(keys[8], (B, num_joints, H, W)) * 0.9
    peaks_hmhp = jax.random.uniform(keys[9], (B, num_joints, H, W)) > 0.97
    gt_hm_hp = jnp.where(peaks_hmhp, 1.0, base_hmhp).astype(jnp.float32)

    ind = jax.random.randint(keys[10], (B, K), 0, HW, jnp.int32)
    reg_mask = (jax.random.uniform(keys[11], (B, K)) > 0.3).astype(jnp.float32)
    gt_wh = jax.random.uniform(keys[12], (B, K, 2), jnp.float32) * 4.0
    gt_reg = jax.random.uniform(keys[13], (B, K, 2), jnp.float32)
    gt_hps = jax.random.normal(keys[14], (B, K, num_joints * 2), jnp.float32) * 2.0
    hps_mask = (
        jax.random.uniform(keys[15], (B, K, num_joints * 2)) > 0.4
    ).astype(jnp.float32)

    hp_ind = jax.random.randint(keys[16], (B, K * num_joints), 0, HW, jnp.int32)
    hp_mask = (
        jax.random.uniform(keys[17], (B, K * num_joints)) > 0.4
    ).astype(jnp.float32)
    gt_hp_offset = jax.random.uniform(keys[18], (B, K * num_joints, 2), jnp.float32)

    batch = {
        "hm": gt_hm,
        "hm_hp": gt_hm_hp,
        "ind": ind,
        "reg_mask": reg_mask,
        "wh": gt_wh,
        "reg": gt_reg,
        "hps": gt_hps,
        "hps_mask": hps_mask,
        "hp_ind": hp_ind,
        "hp_mask": hp_mask,
        "hp_offset": gt_hp_offset,
    }

    loss, stats = multi_pose_loss(outputs, batch, Cfg)
    loss = jax.block_until_ready(loss)

    # sanity check against pure-JAX reference
    ref = jax.block_until_ready(_ref_multi_pose_loss(outputs, batch, Cfg))
    np.testing.assert_allclose(np.asarray(loss), np.asarray(ref), rtol=1e-3, atol=1e-4)

    print("KERNEL_OK")
</pallas_src>

<mosaic_0001>
module attributes {stable_mosaic.version = 11 : i64} {
  func.func @_focal_multi_kernel(%arg0: i32, %arg1: memref<4x128xf32, #tpu.memory_space<vmem>>, %arg2: memref<4x128xf32, #tpu.memory_space<vmem>>, %arg3: memref<8x128xf32, #tpu.memory_space<vmem>>, %arg4: memref<8x128xf32, #tpu.memory_space<vmem>>, %arg5: memref<1x8x128xf32, #tpu.memory_space<vmem>>) attributes {dimension_semantics = [#tpu.dimension_semantics<parallel>], iteration_bounds = array<i64: 2>, scalar_prefetch = 0 : i64, scratch_operands = 0 : i64, tpu.core_type = #tpu.core_type<tc>, window_params = [{transform_indices = @transform_0, window_bounds = array<i64: 4, 128>}, {transform_indices = @transform_1, window_bounds = array<i64: 4, 128>}, {transform_indices = @transform_2, window_bounds = array<i64: 8, 128>}, {transform_indices = @transform_3, window_bounds = array<i64: 8, 128>}, {transform_indices = @transform_4, window_bounds = array<i64: 1, 8, 128>}]} {
    %0 = tpu.iota {dimensions = array<i32: 2>} : vector<1x8x128xi32>
    %cst = arith.constant 0.000000e+00 : f32
    %1 = vector.broadcast %cst : f32 to vector<1x8x128xf32>
    %c0 = arith.constant 0 : index
    %c0_0 = arith.constant 0 : index
    %2 = vector.load %arg1[%c0, %c0_0] : memref<4x128xf32, #tpu.memory_space<vmem>>, vector<4x128xf32>
    %c0_1 = arith.constant 0 : index
    %c0_2 = arith.constant 0 : index
    %3 = vector.load %arg2[%c0_1, %c0_2] : memref<4x128xf32, #tpu.memory_space<vmem>>, vector<4x128xf32>
    %4 = arith.negf %2 : vector<4x128xf32>
    %5 = math.exp %4 : vector<4x128xf32>
    %cst_3 = arith.constant 1.000000e+00 : f32
    %6 = vector.broadcast %cst_3 : f32 to vector<4x128xf32>
    %7 = arith.addf %6, %5 : vector<4x128xf32>
    %8 = arith.divf %6, %7 : vector<4x128xf32>
    %cst_4 = arith.constant 9.99999974E-5 : f32
    %cst_5 = arith.constant 0.999899983 : f32
    %9 = vector.broadcast %cst_4 : f32 to vector<4x128xf32>
    %10 = arith.maximumf %9, %8 : vector<4x128xf32>
    %11 = vector.broadcast %cst_5 : f32 to vector<4x128xf32>
    %12 = arith.minimumf %11, %10 : vector<4x128xf32>
    %cst_6 = arith.constant 1.000000e+00 : f32
    %13 = vector.broadcast %cst_6 : f32 to vector<4x128xf32>
    %14 = arith.cmpf oeq, %3, %13 : vector<4x128xf32>
    %15 = arith.extui %14 : vector<4x128xi1> to vector<4x128xi32>
    %16 = arith.sitofp %15 : vector<4x128xi32> to vector<4x128xf32>
    %cst_7 = arith.constant 1.000000e+00 : f32
    %17 = vector.broadcast %cst_7 : f32 to vector<4x128xf32>
    %18 = arith.subf %17, %16 : vector<4x128xf32>
    %cst_8 = arith.constant 1.000000e+00 : f32
    %19 = vector.broadcast %cst_8 : f32 to vector<4x128xf32>
    %20 = arith.subf %19, %12 : vector<4x128xf32>
    %cst_9 = arith.constant 1.000000e+00 : f32
    %21 = vector.broadcast %cst_9 : f32 to vector<4x128xf32>
    %22 = arith.subf %21, %3 : vector<4x128xf32>
    %23 = arith.mulf %22, %22 : vector<4x128xf32>
    %24 = arith.mulf %23, %23 : vector<4x128xf32>
    %25 = arith.select %14, %12, %20 : vector<4x128xi1>, vector<4x128xf32>
    %26 = math.log %25 : vector<4x128xf32>
    %27 = arith.mulf %20, %20 : vector<4x128xf32>
    %28 = arith.mulf %26, %27 : vector<4x128xf32>
    %29 = arith.mulf %28, %16 : vector<4x128xf32>
    %30 = arith.mulf %12, %12 : vector<4x128xf32>
    %31 = arith.mulf %26, %30 : vector<4x128xf32>
    %32 = arith.mulf %31, %24 : vector<4x128xf32>
    %33 = arith.mulf %32, %18 : vector<4x128xf32>
    %34 = vector.shape_cast %29 : vector<4x128xf32> to vector<1x4x128xf32>
    %cst_10 = arith.constant dense<0.000000e+00> : vector<1xf32>
    %35 = vector.multi_reduction <add>, %34, %cst_10 [1, 2] : vector<1x4x128xf32> to vector<1xf32>
    %36 = vector.shape_cast %35 : vector<1xf32> to vector<1x1x1xf32>
    %37 = vector.extract %36[0, 0, 0] : f32 from vector<1x1x1xf32>
    %38 = vector.shape_cast %33 : vector<4x128xf32> to vector<1x4x128xf32>
    %cst_11 = arith.constant dense<0.000000e+00> : vector<1xf32>
    %39 = vector.multi_reduction <add>, %38, %cst_11 [1, 2] : vector<1x4x128xf32> to vector<1xf32>
    %40 = vector.shape_cast %39 : vector<1xf32> to vector<1x1x1xf32>
    %41 = vector.extract %40[0, 0, 0] : f32 from vector<1x1x1xf32>
    %42 = vector.shape_cast %16 : vector<4x128xf32> to vector<1x4x128xf32>
    %cst_12 = arith.constant dense<0.000000e+00> : vector<1xf32>
    %43 = vector.multi_reduction <add>, %42, %cst_12 [1, 2] : vector<1x4x128xf32> to vector<1xf32>
    %44 = vector.shape_cast %43 : vector<1xf32> to vector<1x1x1xf32>
    %45 = vector.extract %44[0, 0, 0] : f32 from vector<1x1x1xf32>
    %c0_i32 = arith.constant 0 : i32
    %46 = vector.broadcast %c0_i32 : i32 to vector<1x8x128xi32>
    %47 = arith.cmpi eq, %0, %46 : vector<1x8x128xi32>
    %48 = vector.broadcast %37 : f32 to vector<1x8x128xf32>
    %49 = arith.select %47, %48, %1 : vector<1x8x128xi1>, vector<1x8x128xf32>
    %c1_i32 = arith.constant 1 : i32
    %50 = vector.broadcast %c1_i32 : i32 to vector<1x8x128xi32>
    %51 = arith.cmpi eq, %0, %50 : vector<1x8x128xi32>
    %52 = vector.broadcast %41 : f32 to vector<1x8x128xf32>
    %53 = arith.select %51, %52, %49 : vector<1x8x128xi1>, vector<1x8x128xf32>
    %c2_i32 = arith.constant 2 : i32
    %54 = vector.broadcast %c2_i32 : i32 to vector<1x8x128xi32>
    %55 = arith.cmpi eq, %0, %54 : vector<1x8x128xi32>
    %56 = vector.broadcast %45 : f32 to vector<1x8x128xf32>
    %57 = arith.select %55, %56, %53 : vector<1x8x128xi1>, vector<1x8x128xf32>
    %c0_13 = arith.constant 0 : index
    %c0_14 = arith.constant 0 : index
    %58 = vector.load %arg3[%c0_13, %c0_14] : memref<8x128xf32, #tpu.memory_space<vmem>>, vector<8x128xf32>
    %c0_15 = arith.constant 0 : index
    %c0_16 = arith.constant 0 : index
    %59 = vector.load %arg4[%c0_15, %c0_16] : memref<8x128xf32, #tpu.memory_space<vmem>>, vector<8x128xf32>
    %60 = arith.negf %58 : vector<8x128xf32>
    %61 = math.exp %60 : vector<8x128xf32>
    %cst_17 = arith.constant 1.000000e+00 : f32
    %62 = vector.broadcast %cst_17 : f32 to vector<8x128xf32>
    %63 = arith.addf %62, %61 : vector<8x128xf32>
    %64 = arith.divf %62, %63 : vector<8x128xf32>
    %cst_18 = arith.constant 9.99999974E-5 : f32
    %cst_19 = arith.constant 0.999899983 : f32
    %65 = vector.broadcast %cst_18 : f32 to vector<8x128xf32>
    %66 = arith.maximumf %65, %64 : vector<8x128xf32>
    %67 = vector.broadcast %cst_19 : f32 to vector<8x128xf32>
    %68 = arith.minimumf %67, %66 : vector<8x128xf32>
    %cst_20 = arith.constant 1.000000e+00 : f32
    %69 = vector.broadcast %cst_20 : f32 to vector<8x128xf32>
    %70 = arith.cmpf oeq, %59, %69 : vector<8x128xf32>
    %71 = arith.extui %70 : vector<8x128xi1> to vector<8x128xi32>
    %72 = arith.sitofp %71 : vector<8x128xi32> to vector<8x128xf32>
    %cst_21 = arith.constant 1.000000e+00 : f32
    %73 = vector.broadcast %cst_21 : f32 to vector<8x128xf32>
    %74 = arith.subf %73, %72 : vector<8x128xf32>
    %cst_22 = arith.constant 1.000000e+00 : f32
    %75 = vector.broadcast %cst_22 : f32 to vector<8x128xf32>
    %76 = arith.subf %75, %68 : vector<8x128xf32>
    %cst_23 = arith.constant 1.000000e+00 : f32
    %77 = vector.broadcast %cst_23 : f32 to vector<8x128xf32>
    %78 = arith.subf %77, %59 : vector<8x128xf32>
    %79 = arith.mulf %78, %78 : vector<8x128xf32>
    %80 = arith.mulf %79, %79 : vector<8x128xf32>
    %81 = arith.select %70, %68, %76 : vector<8x128xi1>, vector<8x128xf32>
    %82 = math.log %81 : vector<8x128xf32>
    %83 = arith.mulf %76, %76 : vector<8x128xf32>
    %84 = arith.mulf %82, %83 : vector<8x128xf32>
    %85 = arith.mulf %84, %72 : vector<8x128xf32>
    %86 = arith.mulf %68, %68 : vector<8x128xf32>
    %87 = arith.mulf %82, %86 : vector<8x128xf32>
    %88 = arith.mulf %87, %80 : vector<8x128xf32>
    %89 = arith.mulf %88, %74 : vector<8x128xf32>
    %90 = vector.shape_cast %85 : vector<8x128xf32> to vector<1x8x128xf32>
    %cst_24 = arith.constant dense<0.000000e+00> : vector<1xf32>
    %91 = vector.multi_reduction <add>, %90, %cst_24 [1, 2] : vector<1x8x128xf32> to vector<1xf32>
    %92 = vector.shape_cast %91 : vector<1xf32> to vector<1x1x1xf32>
    %93 = vector.extract %92[0, 0, 0] : f32 from vector<1x1x1xf32>
    %94 = vector.shape_cast %89 : vector<8x128xf32> to vector<1x8x128xf32>
    %cst_25 = arith.constant dense<0.000000e+00> : vector<1xf32>
    %95 = vector.multi_reduction <add>, %94, %cst_25 [1, 2] : vector<1x8x128xf32> to vector<1xf32>
    %96 = vector.shape_cast %95 : vector<1xf32> to vector<1x1x1xf32>
    %97 = vector.extract %96[0, 0, 0] : f32 from vector<1x1x1xf32>
    %98 = vector.shape_cast %72 : vector<8x128xf32> to vector<1x8x128xf32>
    %cst_26 = arith.constant dense<0.000000e+00> : vector<1xf32>
    %99 = vector.multi_reduction <add>, %98, %cst_26 [1, 2] : vector<1x8x128xf32> to vector<1xf32>
    %100 = vector.shape_cast %99 : vector<1xf32> to vector<1x1x1xf32>
    %101 = vector.extract %100[0, 0, 0] : f32 from vector<1x1x1xf32>
    %c3_i32 = arith.constant 3 : i32
    %102 = vector.broadcast %c3_i32 : i32 to vector<1x8x128xi32>
    %103 = arith.cmpi eq, %0, %102 : vector<1x8x128xi32>
    %104 = vector.broadcast %93 : f32 to vector<1x8x128xf32>
    %105 = arith.select %103, %104, %57 : vector<1x8x128xi1>, vector<1x8x128xf32>
    %c4_i32 = arith.constant 4 : i32
    %106 = vector.broadcast %c4_i32 : i32 to vector<1x8x128xi32>
    %107 = arith.cmpi eq, %0, %106 : vector<1x8x128xi32>
    %108 = vector.broadcast %97 : f32 to vector<1x8x128xf32>
    %109 = arith.select %107, %108, %105 : vector<1x8x128xi1>, vector<1x8x128xf32>
    %c5_i32 = arith.constant 5 : i32
    %110 = vector.broadcast %c5_i32 : i32 to vector<1x8x128xi32>
    %111 = arith.cmpi eq, %0, %110 : vector<1x8x128xi32>
    %112 = vector.broadcast %101 : f32 to vector<1x8x128xf32>
    %113 = arith.select %111, %112, %109 : vector<1x8x128xi1>, vector<1x8x128xf32>
    %c0_27 = arith.constant 0 : index
    %c0_28 = arith.constant 0 : index
    %c0_29 = arith.constant 0 : index
    %114 = vector.load %arg5[%c0_27, %c0_28, %c0_29] : memref<1x8x128xf32, #tpu.memory_space<vmem>>, vector<1x8x128xf32>
    tpu.vector_store %arg5[%c0_27, %c0_28, %c0_29], %113 {strides = array<i32>} : memref<1x8x128xf32, #tpu.memory_space<vmem>>, vector<1x8x128xf32>,
    return
  }
  func.func @transform_0(%arg0: i32) -> (i32, i32) {
    %c0_i32 = arith.constant 0 : i32
    %c0_i32_0 = arith.constant 0 : i32
    return %c0_i32, %arg0 : i32, i32
  }
  func.func @transform_1(%arg0: i32) -> (i32, i32) {
    %c0_i32 = arith.constant 0 : i32
    %c0_i32_0 = arith.constant 0 : i32
    return %c0_i32, %arg0 : i32, i32
  }
  func.func @transform_2(%arg0: i32) -> (i32, i32) {
    %c0_i32 = arith.constant 0 : i32
    %c0_i32_0 = arith.constant 0 : i32
    return %c0_i32, %arg0 : i32, i32
  }
  func.func @transform_3(%arg0: i32) -> (i32, i32) {
    %c0_i32 = arith.constant 0 : i32
    %c0_i32_0 = arith.constant 0 : i32
    return %c0_i32, %arg0 : i32, i32
  }
  func.func @transform_4(%arg0: i32) -> (i32, i32, i32) {
    %c0_i32 = arith.constant 0 : i32
    %c0_i32_0 = arith.constant 0 : i32
    %c0_i32_1 = arith.constant 0 : i32
    return %arg0, %c0_i32, %c0_i32_0 : i32, i32, i32
  }
}

</mosaic_0001>

<bundles_post_ra>
// kernel: tpu_custom_call.1
= control target key start
LH: loop header
LB: loop body
LE: loop exit
PB: predicated region body
PF: predicated region fallthrough
CT: control target
= control target key end

     0   :  { %s1228_s0 = inlined_call_operand.hbm [shape: f32[4,256], index: 0, kind: input, shape index: {}]   ;;  %s1229_s1 = inlined_call_operand.hbm [shape: f32[4,256], index: 1, kind: input, shape index: {}]   ;;  %s1230_s2 = inlined_call_operand.hbm [shape: f32[8,256], index: 2, kind: input, shape index: {}]   ;;  %s1231_s3 = inlined_call_operand.hbm [shape: f32[8,256], index: 3, kind: input, shape index: {}]   ;;  %s1232_s4 = inlined_call_operand.hbm [shape: f32[2,8,128], index: 4, kind: output, shape index: {}]  }
   0x1   :  { %1238 = sst [smem:[#allocation15_spill]] %s1229_s1 }
   0x2   :  { %9 = vsyncpa [#allocation3], 0 }
   0x3   :  { %11 = vsyncpa [#allocation3 + $0x1], 0 }
   0x4   :  { %12 = vsyncpa [#allocation6], 0 }
   0x5   :  { %14 = vsyncpa [#allocation6 + $0x1], 0 }
   0x6   :  { %15 = vsyncpa [#allocation9], 0 }
   0x7   :  { %17 = vsyncpa [#allocation9 + $0x1], 0 }
   0x8   :  { %18 = vsyncpa [#allocation4], 0 }
   0x9   :  { %20 = vsyncpa [#allocation4 + $0x1], 0  ;;  %s944_s15 = smov 0   ;;  %s946_s16 = smov 0  }
   0xa   :  { %s948_s17 = smov 0   ;;  %s950_s18 = smov 0  }
   0xb LB: > { %s965_s19 = sadd.s32 4294967295, %s911_s18   ;;  %s606_s20 = sadd.s32 4294967294, %s911_s18   ;;  %s911_s18 = sphi %s950_s18, %s1258_s18   ;;  %s907_s17 = sphi %s948_s17, %s1257_s17   ;;  %s903_s16 = sphi %s946_s16, %s1256_s16   ;;  %s899_s15 = sphi %s944_s15, %s1255_s15  }
   0xc   : > { %s969_s21 = sadd.s32 1, %s911_s18   ;;  %s33_s22 = sadd.s32 1, %s907_s17 }
   0xd   : > { %s30_s23 = ssub.s32 %s911_s18, %s969_s21  ;;  %p40_p0 = scmp.ne.s32.totalorder %s907_s17, %s903_s16 }
   0xe   : > { %p31_p1 = scmp.eq.s32.totalorder %s30_s23, 0  ;;  %p41_p2 = scmp.eq.s32.totalorder %s911_s18, 0 }
   0xf   : > { %p46_p3 = scmp.ne.s32.totalorder %s903_s16, %s899_s15  ;;  %p47_p4 = scmp.eq.s32.totalorder %s965_s19, 0 }
  0x10   : > { %s981_s24 = scalar_select %p31_p1, %s907_s17, %s33_s22  }
  0x11   : > { %p42_p5 = por %p41_p2, %p40_p0  ;;  %p983_p6 = por %p47_p4, %p46_p3 }
  0x12   : > { %p148_p7 = scmp.eq.s32.totalorder %s965_s19, 1  ;;  %p154_p8 = scmp.eq.s32.totalorder %s606_s20, 1 }
  0x13   : > { %s1239_s25 = scalar_select %p983_p6, 1, 0 }
  0x14   : > { %p670_p10 = scmp.lt.s32.totalorder %s911_s18, 2  ;;  %p990_p11 = por %p148_p7, %p40_p0 }
  0x15   : > { %p994_p12 = por %p154_p8, %p46_p3  ;;  %s999_s28 = sand.u32 1, %s907_s17  }
  0x16   : > { %s1240_s26 = scalar_select %p990_p11, 1, 0 }
  0x17   : > { %s1241_s27 = scalar_select %p994_p12, 1, 0 }
  0x18   : > { %s610_s29 = sshll.u32 %s911_s18, 6  ;;  %s609_s30 = sshll.u32 %s999_s28, 2 }
  0x19   : > { %p1003_p13 = pnand %p670_p10, %p42_p5  ;;  %s192_s6 = sand.u32 1, %s911_s18  }
  0x1a   : > { %s1243_s1 = sld [smem:[#allocation15_spill]]  ;;  %s196_s10 = scalar_lea.vmem [#allocation5], %s609_s30 }
  0x1b   : > { %s1242_s5 = scalar_select %p1003_p13, 1, 0 }
  0x1c   : > { %s203_s11 = sshll.u32 %s196_s10, 4  ;;  %s1020_s12 = scalar_lea.sflag [#allocation6], %s192_s6  ;;  %s1017_s11 = int_to_ptr.vmem [resolvable:$true] %s203_s11 }
  0x1d   : > { %p1026_p2 = pneg %p1003_p13 }
  0x20   : > { %s1013_s9 = scalar_lea.hbm %s1243_s1, %s610_s29  ;;  %s722_s23 = scalar_lea.hbm %s1243_s1, 128 }
  0x21   : > { %s717_s13 = scalar_lea.hbm %s1013_s9, 64  ;;  %p723_p5 = scmp.lt.u32.totalorder %s1013_s9, %s1243_s1 }
  0x22   : > { %p718_p1 = scmp.ne.s32.totalorder %s1013_s9, %s717_s13  ;;  %p724_p7 = scmp.lt.u32.totalorder %s722_s23, %s717_s13 }
  0x23   : > { %p726_p10 = scmp.lt.u32.totalorder %s717_s13, %s1013_s9 }
  0x24   : > { %p720_p3 = pnand %p1026_p2, %p718_p1  ;;  %p725_p8 = por %p724_p7, %p723_p5 }
  0x26   : > { %p721_p4 = pneg %p720_p3  ;;  %p727_p9 = por %p726_p10, %p725_p8 }
  0x28   : > { %p728_p0 = pnand %p727_p9, %p721_p4 }
  0x2a   : > { %731 = shalt.err (!%p728_p0)
}
  0x2b   : > { %s732_s6 = scalar_lea.vmem %s1017_s11, 64  ;;  %s913_s10 = smov [#allocation5]  }
  0x2c   : > { %p733_p1 = scmp.ne.s32.totalorder %s1017_s11, %s732_s6  ;;  %s737_s20 = sshll.u32 %s913_s10, 4  ;;  %s738_s20 = int_to_ptr.vmem [resolvable:$false] %s737_s20 }
  0x2d   : > { %s739_s22 = scalar_lea.vmem %s738_s20, 128  ;;  %p740_p11 = scmp.lt.s32.totalorder %s1017_s11, %s738_s20 }
  0x2e   : > { %p735_p3 = pnand %p733_p1, %p1026_p2  ;;  %p741_p6 = scmp.lt.s32.totalorder %s739_s22, %s732_s6 }
  0x30   : > { %p736_p12 = pneg %p735_p3  ;;  %p742_p5 = por %p741_p6, %p740_p11 }
  0x32   : > { %p743_p7 = pnand %p742_p5, %p736_p12 }
  0x34   : > { %746 = shalt.err (!%p743_p7)
}
  0x35   : > { %659 = dma.hbm_to_vmem [thread:$0]  (!%p1003_p13), %s1013_s9, 64, %s1017_s11, %s1020_s12  }
  0x36   : > { %p244_p9 = scmp.lt.s32.totalorder %s911_s18, 3  ;;  %s1056_s7 = scalar_lea.hbm %s1228_s0, %s610_s29 }
  0x37   : > { %p1245_p6 = scmp.ge.s32.totalorder %s911_s18, 1  ;;  %s178_s6 = scalar_lea.vmem [#allocation2], %s609_s30 }
  0x38   : > { %s185_s10 = sshll.u32 %s178_s6, 4  ;;  %s1235_s9 = sshll.u32 %s999_s28, 3  ;;  %s1066_s10 = int_to_ptr.vmem [resolvable:$true] %s185_s10 }
  0x39   : > { %p1060_p11 = pnand %p1245_p6, %p244_p9  ;;  %s175_s11 = scalar_lea.sflag [#allocation3], %s999_s28 }
  0x3a   : > { %s747_s20 = scalar_lea.hbm %s1056_s7, 64  ;;  %s752_s13 = scalar_lea.hbm %s1228_s0, 128 }
  0x3b   : > { %s1246_s8 = scalar_select %p1060_p11, 1, 0 }
  0x3c   : > { %p748_p12 = scmp.ne.s32.totalorder %s1056_s7, %s747_s20  ;;  %p753_p8 = scmp.lt.u32.totalorder %s1056_s7, %s1228_s0 }
  0x3d   : > { %p754_p10 = scmp.lt.u32.totalorder %s752_s13, %s747_s20  ;;  %p756_p3 = scmp.lt.u32.totalorder %s747_s20, %s1056_s7 }
  0x3e   : > { %p750_p0 = pnand %p748_p12, %p1026_p2 }
  0x3f   : > { %p755_p1 = por %p754_p10, %p753_p8 }
  0x40   : > { %p751_p4 = pneg %p750_p0 }
  0x41   : > { %p757_p5 = por %p756_p3, %p755_p1 }
  0x43   : > { %p758_p7 = pnand %p757_p5, %p751_p4 }
  0x45   : > { %761 = shalt.err (!%p758_p7)
}
  0x46   : > { %s762_s30 = scalar_lea.vmem %s1066_s10, 64  ;;  %s914_s6 = smov [#allocation2]  }
  0x47   : > { %p763_p9 = scmp.ne.s32.totalorder %s1066_s10, %s762_s30  ;;  %s767_s29 = sshll.u32 %s914_s6, 4  ;;  %s768_s29 = int_to_ptr.vmem [resolvable:$false] %s767_s29 }
  0x48   : > { %s769_s1 = scalar_lea.vmem %s768_s29, 128  ;;  %p770_p0 = scmp.lt.s32.totalorder %s1066_s10, %s768_s29 }
  0x49   : > { %p765_p6 = pnand %p763_p9, %p1026_p2  ;;  %p771_p11 = scmp.lt.s32.totalorder %s769_s1, %s762_s30 }
  0x4b   : > { %p766_p12 = pneg %p765_p6  ;;  %p772_p8 = por %p771_p11, %p770_p0 }
  0x4d   : > { %p773_p10 = pnand %p772_p8, %p766_p12 }
  0x4f   : > { %776 = shalt.err (!%p773_p10)
}
  0x50   : > { %656 = dma.hbm_to_vmem [thread:$0]  (!%p1003_p13), %s1056_s7, 64, %s1066_s10, %s175_s11  }
  0x51   : > { %s614_s20 = sshll.u32 %s911_s18, 7  ;;  %s214_s30 = scalar_lea.vmem [#allocation7], %s1235_s9 }
  0x52   : > { %s1097_s23 = scalar_lea.hbm %s1230_s2, %s614_s20  ;;  %s221_s6 = sshll.u32 %s214_s30, 4  ;;  %s222_s6 = int_to_ptr.vmem [resolvable:$true] %s221_s6 }
  0x53   : > { %s777_s29 = scalar_lea.hbm %s1097_s23, 128  ;;  %s782_s11 = scalar_lea.hbm %s1230_s2, 256 }
  0x54   : > { %p778_p11 = scmp.ne.s32.totalorder %s1097_s23, %s777_s29  ;;  %p783_p3 = scmp.lt.u32.totalorder %s1097_s23, %s1230_s2 }
  0x55   : > { %p784_p5 = scmp.lt.u32.totalorder %s782_s11, %s777_s29  ;;  %p786_p9 = scmp.lt.u32.totalorder %s777_s29, %s1097_s23 }
  0x56   : > { %p780_p4 = pnand %p778_p11, %p1026_p2 }
  0x57   : > { %p785_p7 = por %p784_p5, %p783_p3 }
  0x58   : > { %p781_p1 = pneg %p780_p4 }
  0x59   : > { %p787_p6 = por %p786_p9, %p785_p7 }
  0x5b   : > { %p788_p12 = pnand %p787_p6, %p781_p1 }
  0x5d   : > { %791 = shalt.err (!%p788_p12)
}
  0x5e   : > { %s792_s13 = scalar_lea.vmem %s222_s6, 128  ;;  %s915_s30 = smov [#allocation7]  }
  0x5f   : > { %p793_p0 = scmp.ne.s32.totalorder %s222_s6, %s792_s13  ;;  %s797_s9 = sshll.u32 %s915_s30, 4  ;;  %s798_s9 = int_to_ptr.vmem [resolvable:$false] %s797_s9 }
  0x60   : > { %s799_s7 = scalar_lea.vmem %s798_s9, 256  ;;  %p800_p11 = scmp.lt.s32.totalorder %s222_s6, %s798_s9 }
  0x61   : > { %p795_p8 = pnand %p793_p0, %p1026_p2  ;;  %p801_p4 = scmp.lt.s32.totalorder %s799_s7, %s792_s13 }
  0x63   : > { %p796_p10 = pneg %p795_p8  ;;  %p802_p13 = por %p801_p4, %p800_p11 }
  0x65   : > { %p803_p3 = pnand %p802_p13, %p796_p10 }
  0x67   : > { %806 = shalt.err (!%p803_p3)
}
  0x68   : > { %p1247_p5 = scmp.ne.s32.totalorder %s1242_s5, 0  ;;  %s1124_s11 = scalar_lea.hbm %s1231_s3, %s614_s20 }
  0x69   : > { %s1248_s9 = sshll.u32 %s999_s28, 3  ;;  %s229_s13 = scalar_lea.sflag [#allocation9], %s999_s28 }
  0x6a   : > { %662 = dma.hbm_to_vmem [thread:$0]  (!%p1247_p5), %s1097_s23, 128, %s222_s6, %s1020_s12  }
  0x6b   : > { %s232_s1 = scalar_lea.vmem [#allocation8], %s1248_s9  ;;  %s807_s30 = scalar_lea.hbm %s1124_s11, 128 }
  0x6c   : > { %s239_s22 = sshll.u32 %s232_s1, 4  ;;  %p808_p13 = scmp.ne.s32.totalorder %s1124_s11, %s807_s30  ;;  %s240_s22 = int_to_ptr.vmem [resolvable:$true] %s239_s22 }
  0x6d   : > { %s812_s6 = scalar_lea.hbm %s1231_s3, 256  ;;  %p813_p9 = scmp.lt.u32.totalorder %s1124_s11, %s1231_s3 }
  0x6e   : > { %p810_p1 = pnand %p808_p13, %p1026_p2  ;;  %p814_p6 = scmp.lt.u32.totalorder %s812_s6, %s807_s30 }
  0x6f   : > { %p816_p0 = scmp.lt.u32.totalorder %s807_s30, %s1124_s11 }
  0x70   : > { %p811_p7 = pneg %p810_p1  ;;  %p815_p12 = por %p814_p6, %p813_p9 }
  0x72   : > { %p817_p8 = por %p816_p0, %p815_p12 }
  0x74   : > { %p818_p10 = pnand %p817_p8, %p811_p7 }
  0x76   : > { %821 = shalt.err (!%p818_p10)
}
  0x77   : > { %s822_s28 = scalar_lea.vmem %s240_s22, 128  ;;  %s916_s29 = smov [#allocation8]  }
  0x78   : > { %p823_p11 = scmp.ne.s32.totalorder %s240_s22, %s822_s28  ;;  %s827_s10 = sshll.u32 %s916_s29, 4  ;;  %s828_s10 = int_to_ptr.vmem [resolvable:$false] %s827_s10 }
  0x79   : > { %s829_s9 = scalar_lea.vmem %s828_s10, 256  ;;  %p830_p13 = scmp.lt.s32.totalorder %s240_s22, %s828_s10 }
  0x7a   : > { %p825_p4 = pnand %p823_p11, %p1026_p2  ;;  %p831_p1 = scmp.lt.s32.totalorder %s829_s9, %s822_s28 }
  0x7c   : > { %p826_p3 = pneg %p825_p4  ;;  %p832_p5 = por %p831_p1, %p830_p13 }
  0x7e   : > { %p833_p6 = pnand %p832_p5, %p826_p3 }
  0x80   : > { %836 = shalt.err (!%p833_p6)
}
  0x81   : > { %p1249_p9 = scmp.ne.s32.totalorder %s1242_s5, 0  ;;  %p1250_p7 = scmp.ne.s32.totalorder %s1246_s8, 0 }
  0x82   : > { %s1149_s14 = sand.u32 (!%p1250_p7), 1, %s903_s16   ;;  %p1251_p2 = scmp.ne.s32.totalorder (!%p1250_p7), %s1239_s25, 0 }
  0x83   : > { %665 = dma.hbm_to_vmem [thread:$0]  (!%p1249_p9), %s1124_s11, 128, %s240_s22, %s229_s13  }
  0x84   : > { %248 = sbr.rel (%p1250_p7) target bundleno = 427 (0x1ab), region = 36  ;;  %s618_s1 = sshll.u32 (!%p1250_p7), %s1149_s14, 2 }
  0x85   : > { %s251_s30 = scalar_lea.sflag (!%p1250_p7), [#allocation3], %s1149_s14  ;;  %s254_s12 = scalar_lea.vmem (!%p1250_p7), [#allocation2], %s618_s1 }
  0x8b   : > { %882 = dma.done.wait (%p1251_p2), %s251_s30, 64  }
  0x8c   : > { %884 = vsyncadd (%p1251_p2), %s251_s30, 4294967232  ;;  %s259_s5 = sand.u32 1, %s965_s19   ;;  %s263_s8 = scalar_lea.vmem [#allocation5], %s618_s1 }
  0x8d   : > { %s260_s11 = scalar_lea.sflag [#allocation6], %s259_s5 }
  0x8e   : > { %886 = dma.done.wait (%p1251_p2), %s260_s11, 192  }
  0x8f   : > { %888 = vsyncadd (%p1251_p2), %s260_s11, 4294967104  ;;  %s1163_s22 = sshll.u32 %s1149_s14, 3  ;;  %s278_s23 = scalar_lea.sflag [#allocation9], %s1149_s14 }
  0x90   : > { %s272_s13 = scalar_lea.vmem [#allocation7], %s1163_s22  ;;  %s281_s6 = scalar_lea.vmem [#allocation8], %s1163_s22 }
  0x91   : > { %890 = dma.done.wait (%p1251_p2), %s278_s23, 128  }
  0x92   : > { %892 = vsyncadd (%p1251_p2), %s278_s23, 4294967168  ;;  %v324_v0 = vld [vmem:[%s263_s8] sm:$0xf]  ;;  %vm351_vm0 = vcmask 1043456   ;;  %v323_v1 = vld [vmem:[%s254_s12] sm:$0xf] }
  0x93   : > { %v391_v2 = vld [vmem:[%s272_s13] sm:$0xff]  ;;  %vm333_vm1 = vcmp.eq.f32.partialorder %v324_v0, 1.0  ;;  %v623_v3 = vmul.f32 -1.442695, %v323_v1  ;;  %v917_v4 = vmov 0.0   ;;  %v392_v15 = vld [vmem:[%s281_s6] sm:$0xff] }
  0x94   : > { %v624_v5 = vsel %vm333_vm1, 1.0, %v917_v4  ;;  %v625_v6 = vmul.f32 -1.442695, %v391_v2  ;;  %vm401_vm2 = vcmp.eq.f32.partialorder %v392_v15, 1.0  ;;  %v338_v23 = vsub.f32 1.0, %v324_v0  ;;  %s628_s29 = sshll.u32 %s965_s19, 7 }
  0x95   : > { %v372_v7 = vsel %vm351_vm0, %v624_v5, 0.0  ;;  %705 = vpow2.f32 %v623_v3  ;;  %v406_v24 = vsub.f32 1.0, %v392_v15  ;;  %v336_v36 = vsub.f32 1.0, %v624_v5  ;;  %s320_s10 = scalar_lea.vmem [#allocation10], %s1163_s22  ;;  %s1184_s11 = scalar_lea.hbm %s1232_s4, %s628_s29 }
  0x96   : > { %373 = vadd.xlane.f32.xlu1 %v372_v7  ;;  %707 = vpow2.f32 %v625_v6  ;;  %v339_v25 = vmul.f32 %v338_v23, %v338_v23  ;;  %v626_v37 = vsel %vm401_vm2, 1.0, %v917_v4  ;;  %s470_s9 = sshll.u32 %s320_s10, 4  ;;  %s457_s19 = scalar_lea.sflag [#allocation4], %s1149_s14  ;;  %s1186_s9 = int_to_ptr.vmem [resolvable:$true] %s470_s9 }
  0x97   : > { %v407_v30 = vmul.f32 %v406_v24, %v406_v24  ;;  %v404_v48 = vsub.f32 1.0, %v626_v37  ;;  %s837_s8 = scalar_lea.vmem %s1186_s9, 128  ;;  %p1252_p12 = scmp.ne.s32.totalorder %s1240_s26, 0 }
  0x98   : > { %v340_v33 = vmul.f32 %v339_v25, %v339_v25  ;;  %p838_p5 = scmp.ne.s32.totalorder %s1186_s9, %s837_s8  ;;  %s918_s22 = smov [#allocation10]  }
  0x99   : > { %v408_v41 = vmul.f32 %v407_v30, %v407_v30  ;;  %v321_v30 = vlaneseq  ;;  %s841_s13 = sshll.u32 %s918_s22, 4  ;;  %s842_s13 = int_to_ptr.vmem [resolvable:$false] %s841_s13 }
  0x9a   : > { %p839_p0 = pnand %p838_p5, %p1252_p12  ;;  %s843_s23 = scalar_lea.vmem %s842_s13, 256 }
  0x9b   : > { %p844_p10 = scmp.lt.s32.totalorder %s1186_s9, %s842_s13  ;;  %p845_p11 = scmp.lt.s32.totalorder %s843_s23, %s837_s8 }
  0x9c   : > { %p840_p8 = pneg %p839_p0 }
  0x9d   : > { %p846_p4 = por %p845_p11, %p844_p10 }
  0x9f   : > { %v706_v8 = vpop.eup %705  ;;  %p847_p3 = pnand %p846_p4, %p840_p8 }
  0xa0   : > { %v708_v9 = vpop.eup %707  ;;  %v328_v10 = vadd.f32 1.0, %v706_v8 }
  0xa1   : > { %v396_v11 = vadd.f32 1.0, %v708_v9 }
  0xa2   : > { %709 = vrcp.f32 %v328_v10 }
  0xa3   : > { %711 = vrcp.f32 %v396_v11 }
  0xac   : > { %v710_v12 = vpop.eup %709 }
  0xad   : > { %v712_v13 = vpop.eup %711  ;;  %v331_v14 = vmax.f32 %v710_v12, 0.0001 }
  0xae   : > { %v399_v16 = vmax.f32 %v712_v13, 0.0001 }
  0xaf   : > { %v332_v17 = vmin.f32 %v331_v14, 0.9999 }
  0xb0   : > { %v400_v18 = vmin.f32 %v399_v16, 0.9999 }
  0xb1   : > { %v337_v19 = vsub.f32 1.0, %v332_v17  ;;  %v347_v27 = vmul.f32 %v332_v17, %v332_v17 }
  0xb2   : > { %v405_v20 = vsub.f32 1.0, %v400_v18  ;;  %v415_v31 = vmul.f32 %v400_v18, %v400_v18 }
  0xb3   : > { %v341_v21 = vsel %vm333_vm1, %v332_v17, %v337_v19  ;;  %v344_v26 = vmul.f32 %v337_v19, %v337_v19 }
  0xb4   : > { %713 = vlog2.f32 %v341_v21  ;;  %v409_v22 = vsel %vm401_vm2, %v400_v18, %v405_v20  ;;  %v412_v29 = vmul.f32 %v405_v20, %v405_v20 }
  0xb5   : > { %715 = vlog2.f32 %v409_v22 }
  0xbe   : > { %v714_v28 = vpop.eup %713 }
  0xbf   : > { %v716_v32 = vpop.eup %715  ;;  %v343_v34 = vmul.f32 0.6931472, %v714_v28 }
  0xc0   : > { %v411_v35 = vmul.f32 0.6931472, %v716_v32 }
  0xc1   : > { %v345_v38 = vmul.f32 %v344_v26, %v343_v34  ;;  %v348_v39 = vmul.f32 %v347_v27, %v343_v34 }
  0xc2   : > { %v413_v40 = vmul.f32 %v412_v29, %v411_v35  ;;  %v416_v42 = vmul.f32 %v415_v31, %v411_v35  ;;  %v322_v31 = vand.u32 127, %v321_v30 }
  0xc3   : > { %v346_v43 = vmul.f32 %v624_v5, %v345_v38  ;;  %v349_v44 = vmul.f32 %v348_v39, %v340_v33 }
  0xc4   : > { %v414_v45 = vmul.f32 %v626_v37, %v413_v40  ;;  %v417_v49 = vmul.f32 %v416_v42, %v408_v41  ;;  %vm382_vm3 = vcmp.eq.s32.totalorder %v322_v31, 0  ;;  %vm385_vm4 = vcmp.eq.s32.totalorder %v322_v31, 1 }
  0xc5   : > { %v352_v46 = vsel %vm351_vm0, %v346_v43, 0.0  ;;  %v350_v47 = vmul.f32 %v349_v44, %v336_v36  ;;  %vm388_vm5 = vcmp.eq.s32.totalorder %v322_v31, 2  ;;  %vm446_vm6 = vcmp.eq.s32.totalorder %v322_v31, 3 }
  0xc6   : > { %419 = vadd.xlane.f32.xlu1 %v414_v45  ;;  %353 = vadd.xlane.f32.xlu0 %v352_v46  ;;  %v418_v51 = vmul.f32 %v417_v49, %v404_v48  ;;  %vm449_vm7 = vcmp.eq.s32.totalorder %v322_v31, 4  ;;  %vm452_vm8 = vcmp.eq.s32.totalorder %v322_v31, 5 }
  0xc7   : > { %v362_v50 = vsel %vm351_vm0, %v350_v47, 0.0 }
  0xca   : > { %437 = vadd.xlane.f32.xlu1 %v626_v37  ;;  %363 = vadd.xlane.f32.xlu0 %v362_v50 }
  0xce   : > { %428 = vadd.xlane.f32.xlu0 %v418_v51 }
 0x123   : > { %v374_v52 = vpop.xlane.xlu1 %373 }
 0x124   : > { %v375_v53 = vrot.slane %v374_v52, 4 }
 0x126   : > { %v376_v54 = vadd.f32 %v375_v53, %v374_v52 }
 0x128   : > { %v377_v61 = vrot.slane %v376_v54, 2 }
 0x12a   : > { %v378_v8 = vadd.f32 %v377_v61, %v376_v54 }
 0x12c   : > { %v379_v18 = vrot.slane %v378_v8, 1 }
 0x12e   : > { %v380_v24 = vadd.f32 %v379_v18, %v378_v8 }
 0x153   : > { %v420_v55 = vpop.xlane.xlu1 %419  ;;  %v354_v56 = vpop.xlane.xlu0 %353 }
 0x154   : > { %v421_v57 = vrot.slane %v420_v55, 4  ;;  %v355_v58 = vrot.slane %v354_v56, 4 }
 0x156   : > { %v422_v59 = vadd.f32 %v421_v57, %v420_v55  ;;  %v356_v60 = vadd.f32 %v355_v58, %v354_v56 }
 0x157   : > { %v438_v62 = vpop.xlane.xlu1 %437  ;;  %v364_v63 = vpop.xlane.xlu0 %363 }
 0x158   : > { %v423_v0 = vrot.slane %v422_v59, 2  ;;  %v357_v1 = vrot.slane %v356_v60, 2  ;;  %v439_v2 = vrot.slane %v438_v62, 4  ;;  %v365_v3 = vrot.slane %v364_v63, 4 }
 0x15a   : > { %v440_v4 = vadd.f32 %v439_v2, %v438_v62  ;;  %v366_v5 = vadd.f32 %v365_v3, %v364_v63  ;;  %v358_v6 = vadd.f32 %v357_v1, %v356_v60  ;;  %v424_v9 = vadd.f32 %v423_v0, %v422_v59 }
 0x15b   : > { %v429_v7 = vpop.xlane.xlu0 %428 }
 0x15c   : > { %v441_v10 = vrot.slane %v440_v4, 2  ;;  %v367_v11 = vrot.slane %v366_v5, 2  ;;  %v430_v12 = vrot.slane %v429_v7, 4  ;;  %v359_v13 = vrot.slane %v358_v6, 1 }
 0x15d   : > { %v425_v21 = vrot.slane %v424_v9, 1 }
 0x15e   : > { %v431_v14 = vadd.f32 %v430_v12, %v429_v7  ;;  %v360_v15 = vadd.f32 %v359_v13, %v358_v6  ;;  %v368_v16 = vadd.f32 %v367_v11, %v366_v5  ;;  %v442_v17 = vadd.f32 %v441_v10, %v440_v4 }
 0x15f   : > { %v426_v26 = vadd.f32 %v425_v21, %v424_v9 }
 0x160   : > { %v432_v19 = vrot.slane %v431_v14, 2  ;;  %631 = vpush %v360_v15  ;;  %v369_v20 = vrot.slane %v368_v16, 1  ;;  %v443_v25 = vrot.slane %v442_v17, 1 }
 0x162   : > { %v433_v22 = vadd.f32 %v432_v19, %v431_v14  ;;  %v370_v23 = vadd.f32 %v369_v20, %v368_v16  ;;  %v444_v29 = vadd.f32 %v443_v25, %v442_v17 }
 0x164   : > { %633 = vpush %v370_v23  ;;  %v434_v27 = vrot.slane %v433_v22, 1 }
 0x165   : > { %635 = vpush %v380_v24 }
 0x166   : > { %637 = vpush %v426_v26  ;;  %v435_v28 = vadd.f32 %v434_v27, %v433_v22 }
 0x168   : > { %639 = vpush %v435_v28 }
 0x169   : > { %641 = vpush %v444_v29 }
 0x191   : > { %s632_s25 = spop %631 }
 0x192   : > { %v383_v32 = vstv %s632_s25 }
 0x193   : > { %v384_v33 = vsel %vm382_vm3, %v383_v32, 0.0 }
 0x195   : > { %s634_s20 = spop %633 }
 0x196   : > { %v386_v34 = vstv %s634_s20  ;;  %s636_s7 = spop %635 }
 0x197   : > { %v387_v35 = vsel %vm385_vm4, %v386_v34, %v384_v33  ;;  %v389_v36 = vstv %s636_s7  ;;  %s638_s28 = spop %637 }
 0x198   : > { %v390_v37 = vsel %vm388_vm5, %v389_v36, %v387_v35  ;;  %v447_v38 = vstv %s638_s28 }
 0x199   : > { %v448_v39 = vsel %vm446_vm6, %v447_v38, %v390_v37  ;;  %s640_s1 = spop %639 }
 0x19a   : > { %v450_v40 = vstv %s640_s1  ;;  %s642_s30 = spop %641 }
 0x19b   : > { %v451_v41 = vsel %vm449_vm7, %v450_v40, %v448_v39  ;;  %v453_v42 = vstv %s642_s30 }
 0x19c   : > { %v454_v43 = vsel %vm452_vm8, %v453_v42, %v451_v41 }
 0x19d   : > { %455 = vst [vmem:[%s320_s10] sm:$0xff] %v454_v43 }
 0x19e   : > { %850 = shalt.err (!%p847_p3)
}
 0x19f   : > { %s851_s14 = scalar_lea.hbm %s1184_s11, 128  ;;  %s855_s20 = scalar_lea.hbm %s1232_s4, 256 }
 0x1a0   : > { %p852_p13 = scmp.ne.s32.totalorder %s1184_s11, %s851_s14  ;;  %p856_p9 = scmp.lt.u32.totalorder %s1184_s11, %s1232_s4 }
 0x1a1   : > { %p857_p7 = scmp.lt.u32.totalorder %s855_s20, %s851_s14  ;;  %p859_p5 = scmp.lt.u32.totalorder %s851_s14, %s1184_s11 }
 0x1a2   : > { %p853_p1 = pnand %p852_p13, %p1252_p12 }
 0x1a3   : > { %p858_p2 = por %p857_p7, %p856_p9 }
 0x1a4   : > { %p854_p6 = pneg %p853_p1 }
 0x1a5   : > { %p860_p0 = por %p859_p5, %p858_p2 }
 0x1a7   : > { %p861_p8 = pnand %p860_p0, %p854_p6 }
 0x1a9   : > { %864 = shalt.err (!%p861_p8)
}
 0x1aa   : > { %651 = dma.vmem_to_hbm [thread:$0]  (%p1252_p12), %s1186_s9, 128, %s1184_s11, %s457_s19  }
 0x1ab PF: > { %s482_s29 = sand.u32 1, %s899_s15   ;;  %p1253_p10 = scmp.ne.s32.totalorder %s1241_s27, 0 }
 0x1ac   : > { %p1254_p11 = scmp.ge.s32.totalorder %s911_s18, 2  ;;  %s483_s10 = scalar_lea.sflag [#allocation4], %s482_s29 }
 0x1ae   : > { %p667_p4 = pnand %p1254_p11, %p1253_p10 }
 0x1b0   : > { %894 = dma.done.wait (!%p667_p4), %s483_s10, 128  }
 0x1b1   : > { %896 = vsyncadd (!%p667_p4), %s483_s10, 4294967168  ;;  %p23_p3 = scmp.ge.s32.totalorder %s969_s21, 4   ;;  %s1255_s15 = smov %s903_s16 }
 0x1b2   : > { %s1256_s16 = smov %s907_s17  ;;  %s1257_s17 = smov %s981_s24 }
 0x1b3   : > { %s1258_s18 = smov %s969_s21  ;;  %25 = sbr.rel (!%p23_p3) target bundleno = 11 (0xb), region = 118 }
 0x1ba   :  { %488 = vsyncpa [#allocation3], 1 }
 0x1bb   :  { %490 = vsyncpa [#allocation3 + $0x1], 1 }
 0x1bc   :  { %491 = vsyncpa [#allocation6], 1 }
 0x1bd   :  { %493 = vsyncpa [#allocation6 + $0x1], 1 }
 0x1be   :  { %494 = vsyncpa [#allocation9], 1 }
 0x1bf   :  { %496 = vsyncpa [#allocation9 + $0x1], 1 }
 0x1c0   :  { %497 = vsyncpa [#allocation4], 1 }
 0x1c1   :  { %499 = vsyncpa [#allocation4 + $0x1], 1 }

</bundles_post_ra>
